<compile_context>
chip_gen: v6e
topology: v6e:2x2x1
jax: 0.10.0
libtpu: 0.0.40
codegen_flags: <defaults>
</compile_context>

<pallas_src>
import functools

import jax
import jax.numpy as jnp
from jax.experimental import pallas as pl
from jax.experimental.pallas import tpu as pltpu

OCR_COLS = 50


def _bce_with_logits(x, z):
    # Numerically-stable elementwise BCE-with-logits (matches PyTorch):
    #   max(x, 0) - x*z + log(1 + exp(-|x|))
    return jnp.maximum(x, 0.0) - x * z + jnp.log1p(jnp.exp(-jnp.abs(x)))


def _multitask_loss_kernel(t_ref, x_ref, w_ref, out_ref, *,
                           batch, tile_b, inner, need_mask, ceil_targets):
    c = pl.program_id(0)   # TensorCore split ("parallel"/CORE_PARALLEL)
    i = pl.program_id(1)   # batch tiles ("arbitrary" / reduction)

    # Output block (c, 0, 0) is revisited across i -> stays resident in VMEM and
    # acts as this core's per-column accumulator (P3 pattern).
    @pl.when(i == 0)
    def _():
        out_ref[...] = jnp.zeros_like(out_ref)

    w = w_ref[...].astype(jnp.float32)          # (1, N): alpha/denominator folded in

    def weighted_bce(t_f32, x_f32):
        t = jnp.ceil(t_f32) if ceil_targets else t_f32
        return _bce_with_logits(x_f32, t) * w   # single fused pass over all N cols

    if not need_mask:
        contrib = weighted_bce(t_ref[...].astype(jnp.float32),
                               x_ref[...].astype(jnp.float32))
        out_ref[...] += jnp.sum(contrib, axis=0, keepdims=True)
    else:
        # Mask only the edge / phantom steps; the fast path stays mask-free.
        bi = c * inner + i
        is_edge = (bi + 1) * tile_b > batch

        @pl.when(jnp.logical_not(is_edge))
        def _():
            contrib = weighted_bce(t_ref[...].astype(jnp.float32),
                                   x_ref[...].astype(jnp.float32))
            out_ref[...] += jnp.sum(contrib, axis=0, keepdims=True)

        @pl.when(is_edge)
        def _():
            row = bi * tile_b + jax.lax.broadcasted_iota(jnp.int32, t_ref.shape, 0)
            ok = row < batch
            # Zero out-of-range rows *before* the transcendentals so padded
            # garbage never produces NaN/Inf, then zero their contribution too.
            t = jnp.where(ok, t_ref[...].astype(jnp.float32), 0.0)
            x = jnp.where(ok, x_ref[...].astype(jnp.float32), 0.0)
            contrib = jnp.where(ok, weighted_bce(t, x), 0.0)
            out_ref[...] += jnp.sum(contrib, axis=0, keepdims=True)


def _pick_tile_b(b, n, itemsize):
    # ~4 MiB per input tile -> 2 inputs x 2 pipeline buffers ~= 16 MiB VMEM
    # (covered by the explicit vmem_limit_bytes below), halving per-step
    # overhead relative to 2 MiB tiles on v6e/v7x.
    target_bytes = 4 << 20
    rows = target_bytes // max(1, n * itemsize)
    rows = int(max(8, min(rows, 32768)))
    rows -= rows % 8
    if b <= rows:
        return b          # single full-batch tile (block == full dims is legal)
    return rows


def multitask_loss(targets, scores, class_weight, cls_loss, ocr_loss, *,
                   tile_b=None, input_buffers=2, core_parallel=False,
                   num_padded_cols=0, ceil_targets=True):
    """Pallas implementation of MultiTaskLoss.forward.

    targets, scores: (B, N) with layout [class cols | 50 ocr cols | pad cols].
      Any float dtype (bf16 recommended: halves HBM traffic; upcast in-kernel).
      Pad columns (num_padded_cols) must hold finite values (zeros are fine);
      they receive zero weight and contribute exactly 0.
    class_weight: (N - 50 - num_padded_cols,).
    cls_loss / ocr_loss: python or JAX scalars (alpha1 / alpha2).
    core_parallel: use pltpu.CORE_PARALLEL on the leading grid axis (v7x).
    input_buffers: >2 opts into pl.Buffered(n) pipelining on the inputs.
    ceil_targets: set False when targets are already binary (skips the ceil).
    Returns a scalar f32 (already multiplied by batch size, as in the module).
    """
    b, n = scores.shape
    c_cls = n - OCR_COLS - num_padded_cols
    assert c_cls > 0, "need more than 50 (+pad) columns"
    assert targets.shape == (b, n)
    assert class_weight.shape == (c_cls,)

    t_item = jnp.dtype(targets.dtype).itemsize
    x_item = jnp.dtype(scores.dtype).itemsize
    if tile_b is None:
        tile_b = _pick_tile_b(b, n, max(t_item, x_item))
    else:
        tile_b = int(tile_b)
        if tile_b >= b:
            tile_b = b
        else:
            assert tile_b % 8 == 0, "tile_b must be a multiple of 8 (TPU sublane)"

    num_tiles = -(-b // tile_b)
    if num_tiles >= 2:
        # Always split across the two v7x TensorCores; odd tile counts get one
        # fully-masked phantom step (harmless on single-TC v5e/v6e).
        nsplit, inner = 2, -(-num_tiles // 2)
    else:
        nsplit, inner = 1, num_tiles
    need_mask = (nsplit * inner * tile_b) != b
    last_block = num_tiles - 1

    # Fold alphas and the two PyTorch 'mean' denominators into one per-column
    # weight vector; the final result is scaled by B (== loss * targets.size(0)).
    w_cls = (cls_loss / (b * c_cls)) * class_weight.astype(jnp.float32)
    w_ocr = jnp.full((OCR_COLS,), 1.0, jnp.float32) * (ocr_loss / (b * OCR_COLS))
    pieces = [w_cls, w_ocr]
    if num_padded_cols:
        pieces.append(jnp.zeros((num_padded_cols,), jnp.float32))
    w_col = jnp.concatenate(pieces).reshape(1, n)

    kernel = functools.partial(
        _multitask_loss_kernel,
        batch=b, tile_b=tile_b, inner=inner, need_mask=need_mask,
        ceil_targets=ceil_targets)

    def in_idx(c, i):
        # Clamp so a phantom step (forced nsplit=2 with odd num_tiles) re-reads
        # the last valid block; its contribution is fully masked in-kernel.
        return (jnp.minimum(c * inner + i, last_block), 0)

    if input_buffers > 2:
        pmode = pl.Buffered(input_buffers)
        in_spec_t = pl.BlockSpec((tile_b, n), in_idx, pipeline_mode=pmode)
        in_spec_x = pl.BlockSpec((tile_b, n), in_idx, pipeline_mode=pmode)
    else:
        in_spec_t = pl.BlockSpec((tile_b, n), in_idx)
        in_spec_x = pl.BlockSpec((tile_b, n), in_idx)

    # Explicit scoped-VMEM budget: inputs x buffers x tile + w_col + outputs,
    # with ~25% + 2 MiB headroom (well under v7x's 64 MiB physical per TC).
    in_bytes = input_buffers * tile_b * n * (t_item + x_item)
    misc_bytes = (nsplit + 4) * n * 4
    vmem_limit = max(int(1.25 * (in_bytes + misc_bytes)) + (2 << 20), 16 << 20)

    lead_sem = pltpu.CORE_PARALLEL if core_parallel else "parallel"

    partials = pl.pallas_call(
        kernel,
        out_shape=jax.ShapeDtypeStruct((nsplit, 1, n), jnp.float32),
        grid_spec=pltpu.PrefetchScalarGridSpec(
            num_scalar_prefetch=0,
            grid=(nsplit, inner),
            in_specs=[
                in_spec_t,                                      # targets
                in_spec_x,                                      # scores
                pl.BlockSpec((1, n), lambda c, i: (0, 0)),       # w_col (resident)
            ],
            # Squeezed leading dim -> kernel sees a (1, n) accumulator ref.
            out_specs=pl.BlockSpec((None, 1, n), lambda c, i: (c, 0, 0)),
        ),
        compiler_params=pltpu.CompilerParams(
            dimension_semantics=(lead_sem, "arbitrary"),
            vmem_limit_bytes=vmem_limit),
    )(targets, scores, w_col)

    # Tiny (nsplit, 1, N) cross-lane reduction + batch scaling in plain XLA.
    return jnp.sum(partials) * b


def _reference_loss(targets, scores, class_weight, cls_loss, ocr_loss,
                    num_padded_cols=0):
    # Pure-JAX reference mirroring PyTorch semantics.
    t = jnp.ceil(targets.astype(jnp.float32))
    x = scores.astype(jnp.float32)
    n = x.shape[1] - num_padded_cols
    c_cls = n - OCR_COLS
    l1 = jnp.mean(_bce_with_logits(x[:, :c_cls], t[:, :c_cls]) * class_weight[None, :])
    l2 = jnp.mean(_bce_with_logits(x[:, c_cls:n], t[:, c_cls:n]))
    return (cls_loss * l1 + ocr_loss * l2) * x.shape[0]


if __name__ == "__main__":
    key = jax.random.PRNGKey(0)
    k_t, k_s, k_w = jax.random.split(key, 3)

    B = 4
    C_CLS = 64
    N = C_CLS + OCR_COLS  # 114

    # Targets in [0, 1): ceil() maps 0 -> 0 and anything in (0,1) -> 1.
    targets = jax.random.uniform(k_t, (B, N), dtype=jnp.float32)
    scores = jax.random.normal(k_s, (B, N), dtype=jnp.float32)
    class_weight = jax.random.uniform(
        k_w, (C_CLS,), dtype=jnp.float32, minval=0.5, maxval=1.5)

    cls_loss_coef = 1.0   # alpha1
    ocr_loss_coef = 0.5   # alpha2

    out = multitask_loss(targets, scores, class_weight, cls_loss_coef, ocr_loss_coef)
    out = jax.block_until_ready(out)
    ref = _reference_loss(targets, scores, class_weight, cls_loss_coef, ocr_loss_coef)
    assert jnp.allclose(out, ref, rtol=1e-5, atol=1e-5), (out, ref)

    # Exercise tiled / forced-two-core-split / ragged-tail / phantom-tile paths.
    #   64: even tile count, no mask      60: ragged tail (masked edge step)
    #   40: odd tile count -> forced split + fully-masked phantom step
    #   52: odd tile count AND ragged tail
    for b2, tb in ((64, 8), (60, 8), (40, 8), (52, 8)):
        t2 = jax.random.uniform(jax.random.PRNGKey(1), (b2, N), dtype=jnp.float32)
        s2 = jax.random.normal(jax.random.PRNGKey(2), (b2, N), dtype=jnp.float32)
        o2 = jax.block_until_ready(
            multitask_loss(t2, s2, class_weight, cls_loss_coef, ocr_loss_coef,
                           tile_b=tb))
        r2 = _reference_loss(t2, s2, class_weight, cls_loss_coef, ocr_loss_coef)
        assert jnp.allclose(o2, r2, rtol=1e-5, atol=1e-5), (b2, o2, r2)

    # bf16 caller contract (halves HBM bytes; kernel upcasts in-register).
    t3 = jax.random.uniform(jax.random.PRNGKey(3), (64, N)).astype(jnp.bfloat16)
    s3 = jax.random.normal(jax.random.PRNGKey(4), (64, N)).astype(jnp.bfloat16)
    o3 = jax.block_until_ready(
        multitask_loss(t3, s3, class_weight, cls_loss_coef, ocr_loss_coef,
                       tile_b=16))
    r3 = _reference_loss(t3, s3, class_weight, cls_loss_coef, ocr_loss_coef)
    assert jnp.allclose(o3, r3, rtol=1e-3, atol=1e-3), (o3, r3)

    # Lane-padded producer layout: N padded to 128 with zero-filled pad columns
    # (zero weight -> contribute exactly 0); same result as the unpadded case.
    PAD = 128 - N
    t4 = jnp.pad(targets, ((0, 0), (0, PAD)))
    s4 = jnp.pad(scores, ((0, 0), (0, PAD)))
    o4 = jax.block_until_ready(
        multitask_loss(t4, s4, class_weight, cls_loss_coef, ocr_loss_coef,
                       num_padded_cols=PAD))
    assert jnp.allclose(o4, ref, rtol=1e-5, atol=1e-5), (o4, ref)

    print("KERNEL_OK")
</pallas_src>

<mosaic_0001>
module attributes {stable_mosaic.version = 11 : i64} {
  func.func @_multitask_loss_kernel(%arg0: i32, %arg1: i32, %arg2: memref<4x114xf32, #tpu.memory_space<vmem>>, %arg3: memref<4x114xf32, #tpu.memory_space<vmem>>, %arg4: memref<1x114xf32, #tpu.memory_space<vmem>>, %arg5: memref<1x1x114xf32, #tpu.memory_space<vmem>>) attributes {dimension_semantics = [#tpu.dimension_semantics<parallel>, #tpu.dimension_semantics<arbitrary>], iteration_bounds = array<i64: 1, 1>, scalar_prefetch = 0 : i64, scratch_operands = 0 : i64, tpu.core_type = #tpu.core_type<tc>, window_params = [{transform_indices = @transform_0, window_bounds = array<i64: 4, 114>}, {transform_indices = @transform_1, window_bounds = array<i64: 4, 114>}, {pipeline_mode = #tpu.pipeline_mode<synchronous>, transform_indices = @transform_2, window_bounds = array<i64: 1, 114>}, {transform_indices = @transform_3, window_bounds = array<i64: 1, 1, 114>}]} {
    %c0_i32 = arith.constant 0 : i32
    %0 = arith.cmpi eq, %arg1, %c0_i32 : i32
    %1 = arith.extui %0 : i1 to i32
    %c0_i32_0 = arith.constant 0 : i32
    %2 = arith.cmpi ne, %1, %c0_i32_0 : i32
    scf.if %2 {
      %cst_14 = arith.constant 0.000000e+00 : f32
      %27 = vector.broadcast %cst_14 : f32 to vector<1x114xf32>
      %c0_15 = arith.constant 0 : index
      %c0_16 = arith.constant 0 : index
      %c0_17 = arith.constant 0 : index
      %28 = vector.load %arg5[%c0_15, %c0_16, %c0_17] : memref<1x1x114xf32, #tpu.memory_space<vmem>>, vector<1x1x114xf32>
      %29 = vector.shape_cast %28 : vector<1x1x114xf32> to vector<1x114xf32>
      %30 = vector.shape_cast %27 : vector<1x114xf32> to vector<1x1x114xf32>
      tpu.vector_store %arg5[%c0_15, %c0_16, %c0_17], %30 {strides = array<i32>} : memref<1x1x114xf32, #tpu.memory_space<vmem>>, vector<1x1x114xf32>,
    } else {
    }
    %c0 = arith.constant 0 : index
    %c0_1 = arith.constant 0 : index
    %3 = vector.load %arg4[%c0, %c0_1] : memref<1x114xf32, #tpu.memory_space<vmem>>, vector<1x114xf32>
    %c0_2 = arith.constant 0 : index
    %c0_3 = arith.constant 0 : index
    %4 = vector.load %arg2[%c0_2, %c0_3] : memref<4x114xf32, #tpu.memory_space<vmem>>, vector<4x114xf32>
    %c0_4 = arith.constant 0 : index
    %c0_5 = arith.constant 0 : index
    %5 = vector.load %arg3[%c0_4, %c0_5] : memref<4x114xf32, #tpu.memory_space<vmem>>, vector<4x114xf32>
    %6 = math.ceil %4 : vector<4x114xf32>
    %cst = arith.constant 0.000000e+00 : f32
    %7 = vector.broadcast %cst : f32 to vector<4x114xf32>
    %8 = arith.maximumf %5, %7 : vector<4x114xf32>
    %9 = arith.mulf %5, %6 : vector<4x114xf32>
    %10 = arith.subf %8, %9 : vector<4x114xf32>
    %11 = math.absf %5 : vector<4x114xf32>
    %cst_6 = arith.constant 0.000000e+00 : f32
    %12 = vector.broadcast %cst_6 : f32 to vector<4x114xf32>
    %13 = arith.subf %12, %11 : vector<4x114xf32>
    %14 = math.exp %13 : vector<4x114xf32>
    %15 = math.log1p %14 : vector<4x114xf32>
    %16 = arith.addf %10, %15 : vector<4x114xf32>
    %17 = vector.broadcast %3 : vector<1x114xf32> to vector<4x114xf32>
    %18 = arith.mulf %16, %17 : vector<4x114xf32>
    %c0_7 = arith.constant 0 : index
    %c0_8 = arith.constant 0 : index
    %c0_9 = arith.constant 0 : index
    %19 = vector.load %arg5[%c0_7, %c0_8, %c0_9] : memref<1x1x114xf32, #tpu.memory_space<vmem>>, vector<1x1x114xf32>
    %20 = vector.shape_cast %19 : vector<1x1x114xf32> to vector<1x114xf32>
    %cst_10 = arith.constant dense<0.000000e+00> : vector<114xf32>
    %21 = vector.multi_reduction <add>, %18, %cst_10 [0] : vector<4x114xf32> to vector<114xf32>
    %22 = vector.shape_cast %21 : vector<114xf32> to vector<1x114xf32>
    %23 = arith.addf %20, %22 : vector<1x114xf32>
    %c0_11 = arith.constant 0 : index
    %c0_12 = arith.constant 0 : index
    %c0_13 = arith.constant 0 : index
    %24 = vector.load %arg5[%c0_11, %c0_12, %c0_13] : memref<1x1x114xf32, #tpu.memory_space<vmem>>, vector<1x1x114xf32>
    %25 = vector.shape_cast %24 : vector<1x1x114xf32> to vector<1x114xf32>
    %26 = vector.shape_cast %23 : vector<1x114xf32> to vector<1x1x114xf32>
    tpu.vector_store %arg5[%c0_11, %c0_12, %c0_13], %26 {strides = array<i32>} : memref<1x1x114xf32, #tpu.memory_space<vmem>>, vector<1x1x114xf32>,
    return
  }
  func.func @transform_0(%arg0: i32, %arg1: i32) -> (i32, i32) {
    %c1_i32 = arith.constant 1 : i32
    %0 = arith.muli %arg0, %c1_i32 : i32
    %1 = arith.addi %0, %arg1 : i32
    %c0_i32 = arith.constant 0 : i32
    %2 = arith.minsi %1, %c0_i32 : i32
    %c0_i32_0 = arith.constant 0 : i32
    %c0_i32_1 = arith.constant 0 : i32
    return %2, %c0_i32_0 : i32, i32
  }
  func.func @transform_1(%arg0: i32, %arg1: i32) -> (i32, i32) {
    %c1_i32 = arith.constant 1 : i32
    %0 = arith.muli %arg0, %c1_i32 : i32
    %1 = arith.addi %0, %arg1 : i32
    %c0_i32 = arith.constant 0 : i32
    %2 = arith.minsi %1, %c0_i32 : i32
    %c0_i32_0 = arith.constant 0 : i32
    %c0_i32_1 = arith.constant 0 : i32
    return %2, %c0_i32_0 : i32, i32
  }
  func.func @transform_2(%arg0: i32, %arg1: i32) -> (i32, i32) {
    %c0_i32 = arith.constant 0 : i32
    %c0_i32_0 = arith.constant 0 : i32
    %c0_i32_1 = arith.constant 0 : i32
    return %c0_i32, %c0_i32_0 : i32, i32
  }
  func.func @transform_3(%arg0: i32, %arg1: i32) -> (i32, i32, i32) {
    %c0_i32 = arith.constant 0 : i32
    %c0_i32_0 = arith.constant 0 : i32
    %c0_i32_1 = arith.constant 0 : i32
    return %arg0, %c0_i32, %c0_i32_0 : i32, i32, i32
  }
}

</mosaic_0001>

<bundles_post_ra>
// kernel: tpu_custom_call.1
= control target key start
LH: loop header
LB: loop body
LE: loop exit
PB: predicated region body
PF: predicated region fallthrough
CT: control target
= control target key end

     0   :  { %8 = vsyncpa [#allocation3], 0  ;;  %s234_s0 = inlined_call_operand.hbm [shape: f32[4,114], index: 0, kind: input, shape index: {}]   ;;  %s235_s1 = inlined_call_operand.hbm [shape: f32[4,114], index: 1, kind: input, shape index: {}]   ;;  %s236_s2 = inlined_call_operand.vmem [shape: f32[1,114], index: 2, kind: input, shape index: {}]   ;;  %s237_s3 = inlined_call_operand.hbm [shape: f32[1,1,114], index: 3, kind: output, shape index: {}]  }
   0x1   :  { %9 = vsyncpa [#allocation6], 0 }
   0x2   :  { %10 = vsyncpa [#allocation4], 0  ;;  %s196_s12 = smov [#allocation2]   ;;  %s197_s14 = smov [#allocation5]  }
   0x3   :  { %s22_s13 = sshll.u32 %s196_s12, 4  ;;  %s37_s15 = sshll.u32 %s197_s14, 4  ;;  %s23_s13 = int_to_ptr.vmem [resolvable:$true] %s22_s13  ;;  %s38_s15 = int_to_ptr.vmem [resolvable:$true] %s37_s15 }
   0x4   :  { %s138_s16 = scalar_lea.vmem %s23_s13, 64  ;;  %p143_p1 = scmp.lt.s32.totalorder %s23_s13, %s23_s13 }
   0x5   :  { %p139_p0 = scmp.ne.s32.totalorder %s23_s13, %s138_s16  ;;  %p144_p2 = scmp.lt.s32.totalorder %s138_s16, %s138_s16 }
   0x7   :  { %p145_p3 = por %p144_p2, %p143_p1 }
   0x9   :  { %p146_p4 = pnand %p145_p3, %p139_p0 }
   0xb   :  { %149 = shalt.err (!%p146_p4)
}
   0xc   :  { %25 = dma.hbm_to_vmem [thread:$0]  %s234_s0, 64, %s23_s13, [#allocation3]  }
   0xd   :  { %s158_s19 = scalar_lea.vmem %s38_s15, 64  ;;  %p163_p6 = scmp.lt.s32.totalorder %s38_s15, %s38_s15 }
   0xe   :  { %p159_p5 = scmp.ne.s32.totalorder %s38_s15, %s158_s19  ;;  %p164_p7 = scmp.lt.s32.totalorder %s158_s19, %s158_s19 }
  0x10   :  { %p165_p8 = por %p164_p7, %p163_p6 }
  0x12   :  { %p166_p9 = pnand %p165_p8, %p159_p5 }
  0x14   :  { %169 = shalt.err (!%p166_p9)
}
  0x15   :  { %40 = dma.hbm_to_vmem [thread:$0]  %s235_s1, 64, %s38_s15, [#allocation6]  }
  0x16   :  { %190 = dma.done.wait [#allocation3], 64  }
  0x17   :  { %191 = vsyncadd [#allocation3], 4294967232 }
  0x18   :  { %192 = dma.done.wait [#allocation6], 64  }
  0x19   :  { %193 = vsyncadd [#allocation6], 4294967232  ;;  %vm59_vm0 = vcmask 925696   ;;  %v198_v0 = vmov 0.0   ;;  %v63_v1 = vld [vmem:[#allocation5] sm:$0xf] }
  0x1a   :  { %60 = vst.msk [vmem:[#allocation7] sm:$0x1] %vm59_vm0, %v198_v0  ;;  %v68_v2 = vand.u32 2147483647, %v63_v1  ;;  %v62_v7 = vld [vmem:[#allocation2] sm:$0xf] }
  0x1b   :  { %v64_v9 = vceil.f32 %v62_v7  ;;  %v65_v11 = vmax.f32 %v63_v1, 0.0  ;;  %v121_v18 = vld [vmem:[%s236_s2] ss:$0 sm:$0xff]  ;;  %vm90_vm2 = vcmask 928768   ;;  %s199_s22 = smov [#allocation7]  }
  0x1c   :  { %v69_v3 = vsub.f32 0.0, %v68_v2  ;;  %s107_s23 = sshll.u32 %s199_s22, 4  ;;  %s108_s23 = int_to_ptr.vmem [resolvable:$true] %s107_s23 }
  0x1d   :  { %v66_v12 = vmul.f32 %v64_v9, %v63_v1  ;;  %s170_s24 = scalar_lea.vmem %s108_s23, 16  ;;  %s174_s2 = scalar_lea.vmem %s108_s23, 32 }
  0x1e   :  { %v70_v4 = vmul.f32 1.442695, %v69_v3  ;;  %p171_p10 = scmp.ne.s32.totalorder %s108_s23, %s170_s24  ;;  %p175_p11 = scmp.lt.s32.totalorder %s108_s23, %s108_s23 }
  0x1f   :  { %v67_v16 = vsub.f32 %v65_v11, %v66_v12  ;;  %p176_p12 = scmp.lt.s32.totalorder %s174_s2, %s170_s24 }
  0x20   :  { %126 = vpow2.f32 %v70_v4 }
  0x21   :  { %v89_v28 = vld [vmem:[#allocation7] sm:$0x1]  ;;  %p177_p13 = por %p176_p12, %p175_p11 }
  0x23   :  { %p178_p0 = pnand %p177_p13, %p171_p10 }
  0x2d   :  { %v127_v5 = vpop.eup %126 }
  0x2e   :  { %v72_v6 = vadd.f32 1.0, %v127_v5  ;;  %v75_v8 = vmul.f32 -0.5, %v127_v5  ;;  %v78_v13 = vand.u32 2147483647, %v127_v5 }
  0x30   :  { %128 = vlog2.f32 %v72_v6  ;;  %v76_v10 = vadd.f32 1.0, %v75_v8  ;;  %vm79_vm1 = vcmp.lt.f32.partialorder %v78_v13, 0.0004427343 }
  0x32   :  { %v77_v14 = vmul.f32 %v127_v5, %v76_v10 }
  0x3d   :  { %v129_v15 = vpop.eup %128 }
  0x3e   :  { %v74_v17 = vmul.f32 0.6931472, %v129_v15 }
  0x40   :  { %v80_v19 = vsel %vm79_vm1, %v77_v14, %v74_v17 }
  0x41   :  { %v81_v20 = vadd.f32 %v80_v19, %v67_v16 }
  0x43   :  { %v88_v21 = vmul.f32 %v121_v18, %v81_v20 }
  0x45   :  { %v91_v22 = vsel %vm90_vm2, %v88_v21, 0.0 }
  0x46   :  { %v92_v23 = vrot.slane %v91_v22, 4 }
  0x48   :  { %v93_v24 = vadd.f32 %v92_v23, %v91_v22 }
  0x4a   :  { %v94_v25 = vrot.slane %v93_v24, 2 }
  0x4c   :  { %v95_v26 = vadd.f32 %v94_v25, %v93_v24 }
  0x4e   :  { %v96_v27 = vrot.slane %v95_v26, 1 }
  0x50   :  { %v97_v29 = vadd.f32 %v96_v27, %v95_v26 }
  0x52   :  { %v98_v30 = vadd.f32 %v97_v29, %v89_v28 }
  0x54   :  { %100 = vst.msk [vmem:[#allocation7] sm:$0x1] %vm59_vm0, %v98_v30 }
  0x55   :  { %181 = shalt.err (!%p178_p0)
}
  0x56   :  { %110 = dma.vmem_to_hbm [thread:$0]  %s108_s23, 16, %s237_s3, [#allocation4]  }
  0x57   :  { %194 = dma.done.wait [#allocation4], 16  }
  0x58   :  { %195 = vsyncadd [#allocation4], 4294967280 }
  0x59   :  { %114 = vsyncpa [#allocation3], 1 }
  0x5a   :  { %115 = vsyncpa [#allocation6], 1 }
  0x5b   :  { %116 = vsyncpa [#allocation4], 1 }

</bundles_post_ra>
